<compile_context>
chip_gen: v7x
topology: tpu7x:2x2x1
jax: 0.10.0
libtpu: 0.0.40
codegen_flags: <defaults>
</compile_context>

<pallas_src>
import jax
import jax.numpy as jnp
from jax.experimental import pallas as pl
from jax.experimental.pallas import tpu as pltpu

_VMEM_BUDGET_BYTES = 24 * 1024 * 1024   # budget for ~2 input + 2 output buffers
_VMEM_LIMIT_BYTES = 32 * 1024 * 1024    # explicit scoped-VMEM limit (safe on v5e/v6e/v7x)


# ----------------------------- kernels -------------------------------------


def _fused_calayer_kernel(x_ref, w1t_ref, b1_ref, w2t_ref, b2_ref, o_ref):
    """One grid step = Nb full images: pool + squeeze-excite MLP + scale."""
    x = x_ref[...]                                        # (Nb, C, HW), native dtype
    inv_hw = 1.0 / x.shape[-1]
    # Global average pool over spatial (lane reduction), accumulate in f32.
    pooled = jnp.sum(x.astype(jnp.float32), axis=-1) * inv_hw          # (Nb, C)
    # 1x1 conv #1 (C -> C//r) + LeakyReLU(0.2).
    h = jnp.dot(pooled, w1t_ref[...], preferred_element_type=jnp.float32) + b1_ref[...]
    h = jnp.where(h >= 0, h, 0.2 * h)
    # 1x1 conv #2 (C//r -> C) + sigmoid.
    s = jnp.dot(h, w2t_ref[...], preferred_element_type=jnp.float32) + b2_ref[...]
    s = jax.nn.sigmoid(s)                                              # (Nb, C)
    # Broadcast per-channel attention over the spatial (lane) axis.
    o_ref[...] = x * s[..., None].astype(x.dtype)


def _scale_kernel(x_ref, s_ref, o_ref):
    """Scale-only pass for the two-pass fallback: out = x * s (broadcast)."""
    x = x_ref[...]                                        # (1, Ct, HW)
    o_ref[...] = x * s_ref[...].astype(x.dtype)           # s: (1, Ct, 1), f32


# ----------------------------- wrapper --------------------------------------


def _largest_divisor_at_most(n, cap):
    cap = max(1, min(n, cap))
    for d in range(cap, 0, -1):
        if n % d == 0:
            return d
    return 1


def _pick_channel_tile(C, max_ct):
    """Largest multiple-of-8 divisor of C that fits; else smallest; else full C."""
    cands = [d for d in range(8, C + 1, 8) if C % d == 0]
    if not cands:
        return C
    fitting = [d for d in cands if d <= max_ct]
    return max(fitting) if fitting else min(cands)


def calayer_forward(x_nchw, w1, b1, w2, b2, *, force_two_pass=False):
    """x_nchw: (N, C, H, W); w1: (Cr, C); b1: (Cr,); w2: (C, Cr); b2: (C,)."""
    N, C, H, W = x_nchw.shape
    Cr = w1.shape[0]
    HW = H * W
    itemsize = jnp.dtype(x_nchw.dtype).itemsize

    # Free view: NCHW -> (N, C, H*W). Channels on sublanes, spatial on lanes.
    x = x_nchw.reshape(N, C, HW)
    w1t = jnp.transpose(w1).astype(jnp.float32)          # (C, Cr)
    w2t = jnp.transpose(w2).astype(jnp.float32)          # (Cr, C)
    b1r = b1.reshape(1, Cr).astype(jnp.float32)
    b2r = b2.reshape(1, C).astype(jnp.float32)

    per_image_bytes = C * HW * itemsize
    fused_fits = 4 * per_image_bytes <= _VMEM_BUDGET_BYTES

    if fused_fits and not force_two_pass:
        # Images per grid step: amortize per-step pipeline overhead, but keep
        # >= 2 grid steps when N >= 2 so the v7x megacore has work to split.
        nb_budget = max(1, _VMEM_BUDGET_BYTES // (4 * per_image_bytes))
        nb_cap = nb_budget if N < 2 else min(nb_budget, N // 2)
        Nb = _largest_divisor_at_most(N, nb_cap)
        out = pl.pallas_call(
            _fused_calayer_kernel,
            out_shape=jax.ShapeDtypeStruct((N, C, HW), x.dtype),
            grid_spec=pltpu.PrefetchScalarGridSpec(
                num_scalar_prefetch=0,
                grid=(N // Nb,),
                in_specs=[
                    pl.BlockSpec((Nb, C, HW), lambda n: (n, 0, 0)),
                    pl.BlockSpec((C, Cr), lambda n: (0, 0)),
                    pl.BlockSpec((1, Cr), lambda n: (0, 0)),
                    pl.BlockSpec((Cr, C), lambda n: (0, 0)),
                    pl.BlockSpec((1, C), lambda n: (0, 0)),
                ],
                out_specs=pl.BlockSpec((Nb, C, HW), lambda n: (n, 0, 0)),
            ),
            input_output_aliases={0: 0},
            compiler_params=pltpu.CompilerParams(
                dimension_semantics=("parallel",),
                vmem_limit_bytes=_VMEM_LIMIT_BYTES,
            ),
        )(x, w1t, b1r, w2t, b2r)
        return out.reshape(N, C, H, W)

    # ----- two-pass fallback: a single (C, HW) block would not fit VMEM -----
    # Pass 1: pooled squeeze-excite vector is tiny -> compute in plain XLA.
    pooled = jnp.mean(x.astype(jnp.float32), axis=-1)                  # (N, C)
    h = pooled @ w1t + b1r
    h = jnp.where(h >= 0, h, 0.2 * h)
    s = jax.nn.sigmoid(h @ w2t + b2r)                                  # (N, C)
    s3 = s.reshape(N, C, 1)

    # Pass 2: scale-only kernel tiled over (N, channel slabs); full HW on lanes.
    max_ct = _VMEM_BUDGET_BYTES // (4 * HW * itemsize)
    Ct = _pick_channel_tile(C, max_ct)
    # TODO(synk): if even an (8, HW) slab exceeds VMEM (extreme H*W), tile HW too.
    out = pl.pallas_call(
        _scale_kernel,
        out_shape=jax.ShapeDtypeStruct((N, C, HW), x.dtype),
        grid_spec=pltpu.PrefetchScalarGridSpec(
            num_scalar_prefetch=0,
            grid=(N, C // Ct),
            in_specs=[
                pl.BlockSpec((1, Ct, HW), lambda n, c: (n, c, 0)),
                pl.BlockSpec((1, Ct, 1), lambda n, c: (n, c, 0)),
            ],
            out_specs=pl.BlockSpec((1, Ct, HW), lambda n, c: (n, c, 0)),
        ),
        input_output_aliases={0: 0},
        compiler_params=pltpu.CompilerParams(
            dimension_semantics=("parallel", "parallel"),
            vmem_limit_bytes=_VMEM_LIMIT_BYTES,
        ),
    )(x, s3)
    return out.reshape(N, C, H, W)


# ----------------------------- reference ------------------------------------


def calayer_reference(x_nchw, w1, b1, w2, b2):
    y = jnp.mean(x_nchw, axis=(2, 3))                    # (N, C)
    h = y @ w1.T + b1                                    # (N, Cr)
    h = jnp.where(h >= 0, h, 0.2 * h)
    s = jax.nn.sigmoid(h @ w2.T + b2)                    # (N, C)
    return x_nchw * s[:, :, None, None]


if __name__ == "__main__":
    N, C, H, W = 2, 32, 16, 16
    reduction = 16
    Cr = C // reduction

    key = jax.random.PRNGKey(0)
    kx, k1, k2, k3, k4 = jax.random.split(key, 5)

    x = jax.random.normal(kx, (N, C, H, W), dtype=jnp.float32)
    # Conv2d(C, Cr, 1) weight -> (Cr, C); Conv2d(Cr, C, 1) weight -> (C, Cr)
    w1 = jax.random.normal(k1, (Cr, C), dtype=jnp.float32) * 0.1
    b1 = jax.random.normal(k2, (Cr,), dtype=jnp.float32) * 0.1
    w2 = jax.random.normal(k3, (C, Cr), dtype=jnp.float32) * 0.1
    b2 = jax.random.normal(k4, (C,), dtype=jnp.float32) * 0.1

    ref = calayer_reference(x, w1, b1, w2, b2)

    # Fused single-pass path.
    out = jax.block_until_ready(calayer_forward(x, w1, b1, w2, b2))
    assert out.shape == (N, C, H, W)
    assert jnp.allclose(out, ref, atol=1e-5, rtol=1e-5), "fused path mismatch"

    # Two-pass fallback path (normally used only for very large H*W).
    out2 = jax.block_until_ready(
        calayer_forward(x, w1, b1, w2, b2, force_two_pass=True))
    assert jnp.allclose(out2, ref, atol=1e-5, rtol=1e-5), "two-pass path mismatch"

    # bf16 activations (pool/MLP stay f32 inside the kernel).
    x_bf = x.astype(jnp.bfloat16)
    ref_bf = calayer_reference(x_bf.astype(jnp.float32), w1, b1, w2, b2)
    out_bf = jax.block_until_ready(calayer_forward(x_bf, w1, b1, w2, b2))
    assert out_bf.dtype == jnp.bfloat16
    assert jnp.allclose(out_bf.astype(jnp.float32), ref_bf, atol=5e-2, rtol=5e-2), \
        "bf16 path mismatch"

    print("KERNEL_OK")
</pallas_src>

<mosaic_0001>
module attributes {stable_mosaic.version = 11 : i64} {
  func.func @_fused_calayer_kernel(%arg0: i32, %arg1: memref<1x32x256xf32, #tpu.memory_space<vmem>>, %arg2: memref<32x2xf32, #tpu.memory_space<vmem>>, %arg3: memref<1x2xf32, #tpu.memory_space<vmem>>, %arg4: memref<2x32xf32, #tpu.memory_space<vmem>>, %arg5: memref<1x32xf32, #tpu.memory_space<vmem>>, %arg6: memref<1x32x256xf32, #tpu.memory_space<vmem>>) attributes {dimension_semantics = [#tpu.dimension_semantics<parallel>], iteration_bounds = array<i64: 2>, scalar_prefetch = 0 : i64, scratch_operands = 0 : i64, tpu.core_type = #tpu.core_type<tc>, window_params = [{transform_indices = @transform_0, window_bounds = array<i64: 1, 32, 256>}, {pipeline_mode = #tpu.pipeline_mode<synchronous>, transform_indices = @transform_1, window_bounds = array<i64: 32, 2>}, {pipeline_mode = #tpu.pipeline_mode<synchronous>, transform_indices = @transform_2, window_bounds = array<i64: 1, 2>}, {pipeline_mode = #tpu.pipeline_mode<synchronous>, transform_indices = @transform_3, window_bounds = array<i64: 2, 32>}, {pipeline_mode = #tpu.pipeline_mode<synchronous>, transform_indices = @transform_4, window_bounds = array<i64: 1, 32>}, {transform_indices = @transform_5, window_bounds = array<i64: 1, 32, 256>}]} {
    %c0 = arith.constant 0 : index
    %c0_0 = arith.constant 0 : index
    %c0_1 = arith.constant 0 : index
    %0 = vector.load %arg1[%c0, %c0_0, %c0_1] : memref<1x32x256xf32, #tpu.memory_space<vmem>>, vector<1x32x256xf32>
    %cst = arith.constant dense<0.000000e+00> : vector<1x32xf32>
    %1 = vector.multi_reduction <add>, %0, %cst [2] : vector<1x32x256xf32> to vector<1x32xf32>
    %cst_2 = arith.constant 3.906250e-03 : f32
    %2 = vector.broadcast %cst_2 : f32 to vector<1x32xf32>
    %3 = arith.mulf %1, %2 : vector<1x32xf32>
    %c0_3 = arith.constant 0 : index
    %c0_4 = arith.constant 0 : index
    %4 = vector.load %arg2[%c0_3, %c0_4] : memref<32x2xf32, #tpu.memory_space<vmem>>, vector<32x2xf32>
    %cst_5 = arith.constant dense<0.000000e+00> : vector<1x2xf32>
    %5 = tpu.matmul %3, %4, %cst_5 {dimension_numbers = #tpu.dot_dimension_numbers<[1], [0], [0], [1], [0, 0, 1, 1], [], []>} : vector<1x32xf32>, vector<32x2xf32>, vector<1x2xf32> -> vector<1x2xf32>
    %c0_6 = arith.constant 0 : index
    %c0_7 = arith.constant 0 : index
    %6 = vector.load %arg3[%c0_6, %c0_7] : memref<1x2xf32, #tpu.memory_space<vmem>>, vector<1x2xf32>
    %7 = arith.addf %5, %6 : vector<1x2xf32>
    %cst_8 = arith.constant 0.000000e+00 : f32
    %8 = vector.broadcast %cst_8 : f32 to vector<1x2xf32>
    %9 = arith.cmpf oge, %7, %8 : vector<1x2xf32>
    %cst_9 = arith.constant 2.000000e-01 : f32
    %10 = vector.broadcast %cst_9 : f32 to vector<1x2xf32>
    %11 = arith.mulf %10, %7 : vector<1x2xf32>
    %12 = arith.select %9, %7, %11 : vector<1x2xi1>, vector<1x2xf32>
    %c0_10 = arith.constant 0 : index
    %c0_11 = arith.constant 0 : index
    %13 = vector.load %arg4[%c0_10, %c0_11] : memref<2x32xf32, #tpu.memory_space<vmem>>, vector<2x32xf32>
    %cst_12 = arith.constant dense<0.000000e+00> : vector<1x32xf32>
    %14 = tpu.matmul %12, %13, %cst_12 {dimension_numbers = #tpu.dot_dimension_numbers<[1], [0], [0], [1], [0, 0, 1, 1], [], []>} : vector<1x2xf32>, vector<2x32xf32>, vector<1x32xf32> -> vector<1x32xf32>
    %c0_13 = arith.constant 0 : index
    %c0_14 = arith.constant 0 : index
    %15 = vector.load %arg5[%c0_13, %c0_14] : memref<1x32xf32, #tpu.memory_space<vmem>>, vector<1x32xf32>
    %16 = arith.addf %14, %15 : vector<1x32xf32>
    %17 = arith.negf %16 : vector<1x32xf32>
    %18 = math.exp %17 : vector<1x32xf32>
    %cst_15 = arith.constant 1.000000e+00 : f32
    %19 = vector.broadcast %cst_15 : f32 to vector<1x32xf32>
    %20 = arith.addf %19, %18 : vector<1x32xf32>
    %21 = arith.divf %19, %20 : vector<1x32xf32>
    %22 = vector.shape_cast %21 : vector<1x32xf32> to vector<1x32x1xf32>
    %23 = vector.broadcast %22 : vector<1x32x1xf32> to vector<1x32x256xf32>
    %24 = arith.mulf %0, %23 : vector<1x32x256xf32>
    %c0_16 = arith.constant 0 : index
    %c0_17 = arith.constant 0 : index
    %c0_18 = arith.constant 0 : index
    %25 = vector.load %arg6[%c0_16, %c0_17, %c0_18] : memref<1x32x256xf32, #tpu.memory_space<vmem>>, vector<1x32x256xf32>
    tpu.vector_store %arg6[%c0_16, %c0_17, %c0_18], %24 {strides = array<i32>} : memref<1x32x256xf32, #tpu.memory_space<vmem>>, vector<1x32x256xf32>,
    return
  }
  func.func @transform_0(%arg0: i32) -> (i32, i32, i32) {
    %c0_i32 = arith.constant 0 : i32
    %c0_i32_0 = arith.constant 0 : i32
    %c0_i32_1 = arith.constant 0 : i32
    return %arg0, %c0_i32, %c0_i32_0 : i32, i32, i32
  }
  func.func @transform_1(%arg0: i32) -> (i32, i32) {
    %c0_i32 = arith.constant 0 : i32
    %c0_i32_0 = arith.constant 0 : i32
    %c0_i32_1 = arith.constant 0 : i32
    return %c0_i32, %c0_i32_0 : i32, i32
  }
  func.func @transform_2(%arg0: i32) -> (i32, i32) {
    %c0_i32 = arith.constant 0 : i32
    %c0_i32_0 = arith.constant 0 : i32
    %c0_i32_1 = arith.constant 0 : i32
    return %c0_i32, %c0_i32_0 : i32, i32
  }
  func.func @transform_3(%arg0: i32) -> (i32, i32) {
    %c0_i32 = arith.constant 0 : i32
    %c0_i32_0 = arith.constant 0 : i32
    %c0_i32_1 = arith.constant 0 : i32
    return %c0_i32, %c0_i32_0 : i32, i32
  }
  func.func @transform_4(%arg0: i32) -> (i32, i32) {
    %c0_i32 = arith.constant 0 : i32
    %c0_i32_0 = arith.constant 0 : i32
    %c0_i32_1 = arith.constant 0 : i32
    return %c0_i32, %c0_i32_0 : i32, i32
  }
  func.func @transform_5(%arg0: i32) -> (i32, i32, i32) {
    %c0_i32 = arith.constant 0 : i32
    %c0_i32_0 = arith.constant 0 : i32
    %c0_i32_1 = arith.constant 0 : i32
    return %arg0, %c0_i32, %c0_i32_0 : i32, i32, i32
  }
}

</mosaic_0001>

<bundles_post_ra>
// kernel: tpu_custom_call.1
= control target key start
LH: loop header
LB: loop body
LE: loop exit
PB: predicated region body
PF: predicated region fallthrough
CT: control target
= control target key end

     0   :  { %10 = vsyncpa [#allocation3], 0  ;;  %s1049_s0 = inlined_call_operand.hbm [shape: f32[2,32,256], index: 0, kind: input, shape index: {}, may-alias: {0,5}]   ;;  %s1050_s1 = inlined_call_operand.vmem [shape: f32[32,2], index: 1, kind: input, shape index: {}]   ;;  %s1051_s2 = inlined_call_operand.vmem [shape: f32[1,2], index: 2, kind: input, shape index: {}]   ;;  %s1052_s3 = inlined_call_operand.vmem [shape: f32[2,32], index: 3, kind: input, shape index: {}]   ;;  %s1053_s4 = inlined_call_operand.vmem [shape: f32[1,32], index: 4, kind: input, shape index: {}]   ;;  %s1054_s5 = inlined_call_operand.hbm [shape: f32[2,32,256], index: 5, kind: output, shape index: {}, may-alias: {0,5}]  }
   0x1   :  { %12 = vsyncpa [#allocation3 + $0x1], 0 }
   0x2   :  { %13 = vsyncpa [#allocation4], 0 }
   0x3   :  { %15 = vsyncpa [#allocation4 + $0x1], 0  ;;  %s830_s18 = smov 0   ;;  %s832_s19 = smov 0  }
   0x4   :  { %s834_s20 = smov 0   ;;  %s836_s21 = smov 0  }
   0x5 LB: > { %s851_s22 = sadd.s32 4294967295, %s789_s21   ;;  %s587_s23 = sadd.s32 4294967294, %s789_s21   ;;  %s789_s21 = sphi %s836_s21, %s1067_s21   ;;  %s785_s20 = sphi %s834_s20, %s1066_s20   ;;  %s781_s19 = sphi %s832_s19, %s1065_s19   ;;  %s777_s18 = sphi %s830_s18, %s1064_s18  }
   0x6   : > { %s855_s24 = sadd.s32 1, %s789_s21   ;;  %s28_s25 = sadd.s32 1, %s785_s20 }
   0x7   : > { %s25_s26 = ssub.s32 %s789_s21, %s855_s24  ;;  %p35_p0 = scmp.ne.s32.totalorder %s785_s20, %s781_s19 }
   0x8   : > { %p26_p1 = scmp.eq.s32.totalorder %s25_s26, 0  ;;  %p36_p2 = scmp.eq.s32.totalorder %s789_s21, 0 }
   0x9   : > { %p41_p3 = scmp.ne.s32.totalorder %s781_s19, %s777_s18  ;;  %p42_p4 = scmp.eq.s32.totalorder %s851_s22, 0 }
   0xa   : > { %s867_s27 = scalar_select %p26_p1, %s785_s20, %s28_s25  }
   0xb   : > { %p869_p5 = por %p36_p2, %p35_p0  ;;  %p873_p6 = por %p42_p4, %p41_p3 }
   0xc   : > { %p149_p7 = scmp.eq.s32.totalorder %s851_s22, 1  ;;  %p155_p8 = scmp.eq.s32.totalorder %s587_s23, 1 }
   0xd   : > { %p648_p10 = scmp.lt.s32.totalorder %s789_s21, 2  ;;  %s187_s7 = sand.u32 1, %s785_s20  }
   0xe   : > { %p880_p11 = por %p149_p7, %p35_p0  ;;  %p884_p12 = por %p155_p8, %p41_p3 }
   0xf   : > { %s605_s8 = sshll.u32 %s789_s21, 10  ;;  %s590_s9 = sshll.u32 %s187_s7, 6 }
  0x10   : > { %s1058_s30 = scalar_select %p880_p11, 1, 0 }
  0x11   : > { %s1059_s6 = scalar_select %p884_p12, 1, 0 }
  0x12   : > { %s893_s12 = scalar_lea.hbm %s1049_s0, %s605_s8  ;;  %s191_s13 = scalar_lea.vmem [#allocation2], %s590_s9 }
  0x13   : > { %s198_s14 = sshll.u32 %s191_s13, 4  ;;  %p897_p13 = pnand %p648_p10, %p869_p5  ;;  %s901_s14 = int_to_ptr.vmem [resolvable:$true] %s198_s14 }
  0x14   : > { %s903_s16 = scalar_lea.sflag [#allocation3], %s187_s7  ;;  %s693_s17 = scalar_lea.hbm %s893_s12, 1024 }
  0x15   : > { %p694_p0 = scmp.ne.s32.totalorder %s893_s12, %s693_s17  ;;  %p695_p1 = pneg %p897_p13 }
  0x16   : > { %s698_s26 = scalar_lea.hbm %s1049_s0, 2048  ;;  %p699_p4 = scmp.lt.u32.totalorder %s893_s12, %s1049_s0 }
  0x17   : > { %p696_p2 = pnand %p695_p1, %p694_p0  ;;  %p700_p5 = scmp.lt.u32.totalorder %s698_s26, %s693_s17 }
  0x18   : > { %p702_p8 = scmp.lt.u32.totalorder %s693_s17, %s893_s12 }
  0x19   : > { %p697_p3 = pneg %p696_p2  ;;  %p701_p7 = por %p700_p5, %p699_p4 }
  0x1b   : > { %p703_p10 = por %p702_p8, %p701_p7 }
  0x1d   : > { %p704_p9 = pnand %p703_p10, %p697_p3 }
  0x1f   : > { %707 = shalt.err (!%p704_p9)
}
  0x20   : > { %s708_s7 = scalar_lea.vmem %s901_s14, 1024  ;;  %s791_s9 = smov [#allocation2]  }
  0x21   : > { %p709_p0 = scmp.ne.s32.totalorder %s901_s14, %s708_s7  ;;  %s713_s10 = sshll.u32 %s791_s9, 4  ;;  %s714_s10 = int_to_ptr.vmem [resolvable:$false] %s713_s10 }
  0x22   : > { %s715_s11 = scalar_lea.vmem %s714_s10, 2048  ;;  %p716_p11 = scmp.lt.s32.totalorder %s901_s14, %s714_s10 }
  0x23   : > { %p711_p2 = pnand %p709_p0, %p695_p1  ;;  %p717_p4 = scmp.lt.s32.totalorder %s715_s11, %s708_s7 }
  0x25   : > { %p712_p12 = pneg %p711_p2  ;;  %p718_p5 = por %p717_p4, %p716_p11 }
  0x27   : > { %p719_p7 = pnand %p718_p5, %p712_p12 }
  0x29   : > { %722 = shalt.err (!%p719_p7)
}
  0x2a   : > { %s792_s13 = smov 256   ;;  %s793_s17 = smov 16  }
  0x2b   : > { %643 = dma.hbm_to_vmem [thread:$0]  (!%p897_p13), %s893_s12, 1024, %s901_s14, %s903_s16, %s792_s13, %s792_s13, %s793_s17  }
  0x2c   : > { %p593_p9 = scmp.ge.s32.totalorder %s789_s21, 1  ;;  %p206_p1 = scmp.lt.s32.totalorder %s789_s21, 3 }
  0x2e   : > { %p207_p3 = pnand %p593_p9, %p206_p1 }
  0x2f   : > { %s934_s23 = sand.u32 (!%p207_p3), 1, %s781_s19  }
  0x30   : > { %210 = sbr.rel (%p207_p3) target bundleno = 811 (0x32b), region = 40  ;;  %s594_s25 = sshll.u32 (!%p207_p3), %s934_s23, 6 }
  0x31   : > { %s213_s26 = scalar_lea.sflag (!%p207_p3), [#allocation3], %s934_s23  ;;  %s216_s28 = scalar_lea.vmem (!%p207_p3), [#allocation2], %s594_s25 }
  0x37   : > { %768 = dma.done.wait (%p873_p6), %s213_s26, 1024  }
  0x38   : > { %770 = vsyncadd (%p873_p6), %s213_s26, 4294966272  ;;  %v944_v0 = vld [vmem:[%s216_s28] sm:$0xff]  ;;  %v946_v1 = vld [vmem:[%s216_s28 + $0x8] sm:$0xff]  ;;  %v794_v15 = vmov 0.0|0.0   ;;  %vm795_vm0 = vmmov 0   ;;  %v796_v19 = vmov 0.0   ;;  %v276_v20 = vlaneseq }
  0x39   : > { %v948_v2 = vld [vmem:[%s216_s28 + $0x20] sm:$0xff]  ;;  %v251_v3 = vadd.f32 %v946_v1, %v944_v0  ;;  %v952_v4 = vld [vmem:[%s216_s28 + $0x28] sm:$0xff]  ;;  %v954_v5 = vld [vmem:[%s216_s28 + $0x10] sm:$0xff]  ;;  %630 = vmatprep.subr.bf16.mxu0 %v794_v15  ;;  %622 = vmatprep.mubr.msk.f32.mxu0 %vm795_vm0, %v796_v19  ;;  %vm287_vm1 = vcmask 130112   ;;  %vm294_vm2 = vcmask 195712   ;;  %vm301_vm3 = vcmask 261312  }
  0x3a   : > { %v956_v6 = vld [vmem:[%s216_s28 + $0x18] sm:$0xff]  ;;  %v257_v7 = vadd.f32 %v952_v4, %v948_v2  ;;  %v960_v8 = vld [vmem:[%s216_s28 + $0x30] sm:$0xff]  ;;  %v267_v12 = vld [vmem:[%s1050_s1] sm:$0xff]  ;;  %625 = vmatprep.subr.mxu1 %v796_v19  ;;  %627 = vmatprep.mubr.msk.f32.mxu1 %vm795_vm0, %v796_v19  ;;  %v277_v21 = vand.u32 127, %v276_v20  ;;  %v279_v22 = vshrl.u32 %v276_v20, 7  ;;  %vm303_vm4 = vcmask 261120  }
  0x3b   : > { %v962_v9 = vld [vmem:[%s216_s28 + $0x38] sm:$0xff]  ;;  %252 = vadd.xlane.f32.xlu0 %v251_v3  ;;  %v254_v10 = vadd.f32 %v956_v6, %v954_v5  ;;  %v268_v13 = vld [vmem:[%s1050_s1 + $0x8] sm:$0xff]  ;;  %v269_v16 = vld [vmem:[%s1050_s1 + $0x10] sm:$0xff]  ;;  %vm385_vm5 = vcmask 1041408   ;;  %vm381_vm7 = vcmask 15360   ;;  %s242_s29 = scalar_lea.vmem [#allocation5], %s594_s25 }
  0x3c   : > { %258 = vadd.xlane.f32.xlu1 %v257_v7  ;;  %v260_v11 = vadd.f32 %v962_v9, %v960_v8  ;;  %v631_v14 = vpack.c.bf16 %v268_v13, %v267_v12  ;;  %v270_v17 = vld [vmem:[%s1050_s1 + $0x18] sm:$0xff]  ;;  %v282_v23 = vadd.s32 4294967288, %v277_v21  ;;  %v289_v25 = vadd.s32 4294967280, %v277_v21  ;;  %v379_v45 = vld [vmem:[%s1052_s3] sm:$0x3]  ;;  %s514_s12 = sshll.u32 %s242_s29, 4  ;;  %s998_s12 = int_to_ptr.vmem [resolvable:$true] %s514_s12 }
  0x3d   : > { %v634_v18 = vpack.c.bf16 %v270_v17, %v269_v16  ;;  %v296_v26 = vadd.s32 4294967272, %v277_v21  ;;  %v280_v28 = vsub.s32 %v277_v21, %v279_v22  ;;  %626 = vmatpush3.msk.msra.mxu1 %vm385_vm5, %v379_v45  ;;  %v271_v46 = vld [vmem:[%s1051_s2] sm:$0x1]  ;;  %v467_v59 = vsub.s32 0, %v279_v22  ;;  %s606_s14 = sshll.u32 %s851_s22, 10  ;;  %s501_s22 = scalar_lea.sflag [#allocation4], %s934_s23 }
  0x3e   : > { %632 = vmatpush3.bf16.msra.mxu0 %v631_v14  ;;  %v285_v30 = vsub.s32 %v282_v23, %v279_v22  ;;  %v292_v31 = vsub.s32 %v289_v25, %v279_v22  ;;  %v380_v52 = vld [vmem:[%s1053_s4] sm:$0x1]  ;;  %s1003_s16 = scalar_lea.hbm %s1054_s5, %s606_s14  ;;  %s723_s8 = scalar_lea.vmem %s998_s12, 1024 }
  0x3f   : > { %255 = vadd.xlane.f32.xlu0 %v254_v10  ;;  %633 = vmatprep.subr.bf16.mxu0 %v794_v15  ;;  %v299_v34 = vsub.s32 %v296_v26, %v279_v22  ;;  %p724_p6 = scmp.ne.s32.totalorder %s998_s12, %s723_s8  ;;  %p1061_p11 = scmp.ne.s32.totalorder %s1058_s30, 0 }
  0x40   : > { %261 = vadd.xlane.f32.xlu1 %v260_v11  ;;  %s797_s7 = smov [#allocation5]  }
  0x41   : > { %p725_p12 = pnand %p724_p6, %p1061_p11  ;;  %s727_s9 = sshll.u32 %s797_s7, 4  ;;  %s728_s9 = int_to_ptr.vmem [resolvable:$false] %s727_s9 }
  0x42   : > { %635 = vmatpush3.bf16.msra.mxu0 %v634_v18  ;;  %s729_s10 = scalar_lea.vmem %s728_s9, 2048  ;;  %p730_p8 = scmp.lt.s32.totalorder %s998_s12, %s728_s9 }
  0x43   : > { %p726_p13 = pneg %p725_p12  ;;  %p731_p10 = scmp.lt.s32.totalorder %s729_s10, %s723_s8 }
  0x45   : > { %p732_p0 = por %p731_p10, %p730_p8 }
  0x47   : > { %p733_p2 = pnand %p732_p0, %p726_p13 }
  0xc8   : > { %v253_v24 = vpop.xlane.xlu0 %252 }
  0xc9   : > { %v259_v27 = vpop.xlane.xlu1 %258  ;;  %v263_v29 = vmul.f32 0.00390625, %v253_v24 }
  0xca   : > { %v265_v32 = vmul.f32 0.00390625, %v259_v27 }
  0xcb   : > { %v281_v38 = vrot.slane %v263_v29, %v280_v28 }
  0xcc   : > { %v256_v33 = vpop.xlane.xlu0 %255  ;;  %v293_v40 = vrot.slane %v265_v32, %v292_v31 }
  0xcd   : > { %v264_v35 = vmul.f32 0.00390625, %v256_v33  ;;  %v262_v36 = vpop.xlane.xlu1 %261 }
  0xce   : > { %v266_v37 = vmul.f32 0.00390625, %v262_v36 }
  0xcf   : > { %v286_v39 = vrot.slane %v264_v35, %v285_v30 }
  0xd0   : > { %v300_v41 = vrot.slane %v266_v37, %v299_v34 }
  0xd1   : > { %v288_v42 = vsel %vm287_vm1, %v286_v39, %v281_v38 }
  0xd2   : > { %v295_v43 = vsel %vm294_vm2, %v293_v40, %v288_v42 }
  0xd3   : > { %v302_v44 = vsel %vm301_vm3, %v300_v41, %v295_v43 }
  0xd4   : > { %623 = vmatmul.mubr.msk.f32.vlgmr.msra.gmra.mrb[0].mxu0 %vm303_vm4, %v302_v44 }
 0x1a7   : > { %v372_v47 = vpop.f32.mrb[0].mxu0 }
 0x1a8   : > { %v373_v48 = vadd.f32 %v372_v47, %v271_v46  ;;  %v624_v49 = vpop.f32.mrb[1].mxu0 }
 0x1aa   : > { %vm376_vm6 = vcmp.ge.f32.partialorder %v373_v48, 0.0  ;;  %v377_v50 = vmul.f32 0.2, %v373_v48 }
 0x1ac   : > { %v378_v51 = vsel %vm376_vm6, %v373_v48, %v377_v50 }
 0x1ad   : > { %628 = vmatmul.mubr.msk.f32.vlgmr.msra.gmra.mrb[0].mxu1 %vm381_vm7, %v378_v51 }
 0x280   : > { %v455_v53 = vpop.f32.mrb[0].mxu1 }
 0x281   : > { %v456_v54 = vadd.f32 %v455_v53, %v380_v52  ;;  %v629_v55 = vpop.f32.mrb[1].mxu1 }
 0x283   : > { %v599_v56 = vmul.f32 -1.442695, %v456_v54 }
 0x285   : > { %689 = vpow2.f32 %v599_v56 }
 0x28f   : > { %v690_v57 = vpop.eup %689 }
 0x290   : > { %v462_v58 = vadd.f32 1.0, %v690_v57 }
 0x292   : > { %691 = vrcp.f32 %v462_v58 }
 0x29c   : > { %v692_v60 = vpop.eup %691 }
 0x29d   : > { %v468_v61 = vrot.slane %v692_v60, %v467_v59 }
 0x29f   : > { %474 = vbcast.lane.b32.xlu1 %v468_v61, 264  ;;  %470 = vbcast.lane.b32.xlu0 %v468_v61, 256 }
 0x2a3   : > { %478 = vbcast.lane.b32.xlu1 %v468_v61, 272 }
 0x2a7   : > { %482 = vbcast.lane.b32.xlu1 %v468_v61, 280 }
 0x311   : > { %v475_v62 = vpop.permute.xlu1 %474  ;;  %v471_v63 = vpop.permute.xlu0 %470 }
 0x312   : > { %v486_v3 = vmul.f32 %v475_v62, %v954_v5  ;;  %v487_v7 = vmul.f32 %v475_v62, %v956_v6  ;;  %v484_v10 = vmul.f32 %v471_v63, %v944_v0  ;;  %v485_v11 = vmul.f32 %v471_v63, %v946_v1 }
 0x314   : > { %494 = vst [vmem:[%s242_s29 + $0x10] sm:$0xff] %v486_v3  ;;  %495 = vst [vmem:[%s242_s29 + $0x18] sm:$0xff] %v487_v7 }
 0x315   : > { %492 = vst [vmem:[%s242_s29] sm:$0xff] %v484_v10  ;;  %493 = vst [vmem:[%s242_s29 + $0x8] sm:$0xff] %v485_v11  ;;  %v479_v12 = vpop.permute.xlu1 %478 }
 0x316   : > { %v488_v13 = vmul.f32 %v479_v12, %v948_v2  ;;  %v489_v5 = vmul.f32 %v479_v12, %v952_v4 }
 0x318   : > { %496 = vst [vmem:[%s242_s29 + $0x20] sm:$0xff] %v488_v13  ;;  %497 = vst [vmem:[%s242_s29 + $0x28] sm:$0xff] %v489_v5 }
 0x319   : > { %v483_v0 = vpop.permute.xlu1 %482 }
 0x31a   : > { %v490_v1 = vmul.f32 %v483_v0, %v960_v8  ;;  %v491_v2 = vmul.f32 %v483_v0, %v962_v9 }
 0x31c   : > { %498 = vst [vmem:[%s242_s29 + $0x30] sm:$0xff] %v490_v1  ;;  %499 = vst [vmem:[%s242_s29 + $0x38] sm:$0xff] %v491_v2 }
 0x31d   : > { %736 = shalt.err (!%p733_p2)
}
 0x31e   : > { %s737_s11 = scalar_lea.hbm %s1003_s16, 1024  ;;  %s741_s26 = scalar_lea.hbm %s1054_s5, 2048 }
 0x31f   : > { %p738_p4 = scmp.ne.s32.totalorder %s1003_s16, %s737_s11  ;;  %p742_p9 = scmp.lt.u32.totalorder %s1003_s16, %s1054_s5 }
 0x320   : > { %p743_p1 = scmp.lt.u32.totalorder %s741_s26, %s737_s11  ;;  %p745_p6 = scmp.lt.u32.totalorder %s737_s11, %s1003_s16 }
 0x321   : > { %p739_p5 = pnand %p738_p4, %p1061_p11 }
 0x322   : > { %p744_p3 = por %p743_p1, %p742_p9 }
 0x323   : > { %p740_p7 = pneg %p739_p5 }
 0x324   : > { %p746_p12 = por %p745_p6, %p744_p3 }
 0x326   : > { %p747_p13 = pnand %p746_p12, %p740_p7 }
 0x328   : > { %750 = shalt.err (!%p747_p13)
}
 0x329   : > { %s798_s14 = smov 256   ;;  %s799_s25 = smov 16  }
 0x32a   : > { %638 = dma.vmem_to_hbm [thread:$0]  (%p1061_p11), %s998_s12, 1024, %s1003_s16, %s501_s22, %s798_s14, %s798_s14, %s799_s25  }
 0x32b PF: > { %s529_s15 = sand.u32 1, %s777_s18   ;;  %p1062_p8 = scmp.ne.s32.totalorder %s1059_s6, 0 }
 0x32c   : > { %p1063_p10 = scmp.ge.s32.totalorder %s789_s21, 2  ;;  %s530_s8 = scalar_lea.sflag [#allocation4], %s529_s15 }
 0x32e   : > { %p645_p0 = pnand %p1063_p10, %p1062_p8 }
 0x330   : > { %772 = dma.done.wait (!%p645_p0), %s530_s8, 1024  }
 0x331   : > { %774 = vsyncadd (!%p645_p0), %s530_s8, 4294966272  ;;  %p18_p2 = scmp.ge.s32.totalorder %s855_s24, 4   ;;  %s1064_s18 = smov %s781_s19 }
 0x332   : > { %s1065_s19 = smov %s785_s20  ;;  %s1066_s20 = smov %s867_s27 }
 0x333   : > { %s1067_s21 = smov %s855_s24  ;;  %20 = sbr.rel (!%p18_p2) target bundleno = 5 (0x5), region = 85 }
 0x33a   :  { %535 = vsyncpa [#allocation3], 1 }
 0x33b   :  { %537 = vsyncpa [#allocation3 + $0x1], 1 }
 0x33c   :  { %538 = vsyncpa [#allocation4], 1 }
 0x33d   :  { %540 = vsyncpa [#allocation4 + $0x1], 1 }

</bundles_post_ra>
